<compile_context>
chip_gen: v7x
topology: tpu7x:2x2x1
jax: 0.10.0
libtpu: 0.0.40
codegen_flags: <defaults>
</compile_context>

<pallas_src>
import math
import jax
import jax.numpy as jnp
from jax.experimental import pallas as pl
from jax.experimental.pallas import tpu as pltpu


def _round_up(x, m):
    return ((x + m - 1) // m) * m


def gdn_kernel(x_ref, w1_ref, w2_ref, o_ref):
    # x_ref : (tm, F)   tile of node embeddings (bf16 or f32)
    # w1_ref: (F, E)    full weight (VMEM-resident across grid steps)
    # w2_ref: (E, C)    full weight (f32)
    # o_ref : (tm, C)   tile of logits (f32)
    h = jnp.dot(x_ref[...], w1_ref[...], preferred_element_type=jnp.float32)
    # LeakyReLU(negative_slope=0.3) on the f32 accumulator.
    h = jnp.where(h >= 0, h, 0.3 * h)
    o_ref[...] = jnp.dot(h, w2_ref[...],
                         preferred_element_type=jnp.float32).astype(o_ref.dtype)


def gdn_forward(embeds1, w1, w2, *, tm=None, use_bf16=True):
    """Fused (embeds1 @ w1 -> LeakyReLU(0.3) -> @ w2) on TPU via Pallas."""
    N, F = embeds1.shape
    F2, E = w1.shape
    E2, C = w2.shape
    assert F == F2 and E == E2

    # Row tile: >=4 grid steps when N is large enough (so 'parallel' can shard
    # across v7x's two TensorCores), capped to keep per-step VMEM small on all
    # generations.  Always a multiple of 8 (sublane).
    if tm is None:
        tm = max(8, _round_up(pl.cdiv(N, 4), 8))
    tm = max(8, _round_up(min(tm, 8192), 8))
    grid = pl.cdiv(N, tm)

    # bf16 activations / first weight by default (f32 accumulation on the MXU).
    # Ideally the producer hands us bf16 directly; the astype here is a single
    # pass and only happens if dtypes differ.
    in_dtype = jnp.bfloat16 if use_bf16 else jnp.float32
    x = embeds1 if embeds1.dtype == in_dtype else embeds1.astype(in_dtype)
    w1c = w1 if w1.dtype == in_dtype else w1.astype(in_dtype)
    w2c = w2 if w2.dtype == jnp.float32 else w2.astype(jnp.float32)

    itemsize = jnp.dtype(in_dtype).itemsize
    cost = pl.CostEstimate(
        flops=2 * N * F * E + 2 * N * E * C,
        transcendentals=0,
        bytes_accessed=(N * F * itemsize            # x read
                        + F * E * itemsize          # w1 read
                        + E * C * 4                 # w2 read
                        + N * C * 4))               # out write

    out = pl.pallas_call(
        gdn_kernel,
        out_shape=jax.ShapeDtypeStruct((N, C), jnp.float32),
        grid_spec=pl.GridSpec(
            grid=(grid,),
            in_specs=[
                pl.BlockSpec((tm, F), lambda i: (i, 0)),   # node tile (partial last tile OK)
                pl.BlockSpec((F, E), lambda i: (0, 0)),    # weight1 (whole, constant index)
                pl.BlockSpec((E, C), lambda i: (0, 0)),    # weight2 (whole, constant index)
            ],
            out_specs=pl.BlockSpec((tm, C), lambda i: (i, 0)),
        ),
        compiler_params=pltpu.CompilerParams(
            dimension_semantics=("parallel",)),
        cost_estimate=cost,
    )(x, w1c, w2c)

    return out


def xavier_uniform(key, shape, dtype=jnp.float32):
    fan_in, fan_out = shape
    bound = math.sqrt(6.0 / (fan_in + fan_out))
    return jax.random.uniform(key, shape, dtype, minval=-bound, maxval=bound)


def reference_forward(embeds1, w1, w2, *, cast_bf16=False):
    if cast_bf16:
        embeds1 = embeds1.astype(jnp.bfloat16).astype(jnp.float32)
        w1 = w1.astype(jnp.bfloat16).astype(jnp.float32)
    h = embeds1 @ w1
    h = jnp.where(h >= 0, h, 0.3 * h)
    return h @ w2


if __name__ == "__main__":
    # Module-consistent small shapes:
    #   inter1 output dim = 96 (fixed by the module), embed_dim = 32,
    #   num_classes = 4.
    IN_DIM, EMBED_DIM, NUM_CLASSES = 96, 32, 4

    key = jax.random.PRNGKey(0)
    k_x, k_w1, k_w2, k_x2 = jax.random.split(key, 4)

    weight = xavier_uniform(k_w1, (IN_DIM, EMBED_DIM))        # (96, embed_dim)
    weight2 = xavier_uniform(k_w2, (EMBED_DIM, NUM_CLASSES))  # (embed_dim, C)

    # --- small case: N = 8 nodes, f32 path, tight tolerance ---
    N1 = 8
    embeds1 = jax.random.normal(k_x, (N1, IN_DIM), dtype=jnp.float32)
    out1 = jax.block_until_ready(
        gdn_forward(embeds1, weight, weight2, use_bf16=False))
    ref1 = reference_forward(embeds1, weight, weight2)
    assert out1.shape == (N1, NUM_CLASSES)
    assert jnp.allclose(out1, ref1, atol=1e-4, rtol=1e-4), "mismatch (N=8, f32)"

    # --- non-multiple node count: partial last tile + multi-step grid,
    #     default bf16 path (compare against a bf16-quantized reference) ---
    N2 = 1000
    embeds2 = jax.random.normal(k_x2, (N2, IN_DIM), dtype=jnp.float32)
    out2 = jax.block_until_ready(gdn_forward(embeds2, weight, weight2))
    ref2 = reference_forward(embeds2, weight, weight2, cast_bf16=True)
    assert out2.shape == (N2, NUM_CLASSES)
    assert jnp.allclose(out2, ref2, atol=2e-2, rtol=2e-2), "mismatch (N=1000, bf16)"

    print("KERNEL_OK")
</pallas_src>

<mosaic_0001>
module attributes {stable_mosaic.version = 11 : i64} {
  func.func @gdn_kernel(%arg0: i32, %arg1: memref<8x96xf32, #tpu.memory_space<vmem>>, %arg2: memref<96x32xf32, #tpu.memory_space<vmem>>, %arg3: memref<32x4xf32, #tpu.memory_space<vmem>>, %arg4: memref<8x4xf32, #tpu.memory_space<vmem>>) attributes {dimension_semantics = [#tpu.dimension_semantics<parallel>], iteration_bounds = array<i64: 1>, scalar_prefetch = 0 : i64, scratch_operands = 0 : i64, tpu.core_type = #tpu.core_type<tc>, window_params = [{transform_indices = @transform_0, window_bounds = array<i64: 8, 96>}, {pipeline_mode = #tpu.pipeline_mode<synchronous>, transform_indices = @transform_1, window_bounds = array<i64: 96, 32>}, {pipeline_mode = #tpu.pipeline_mode<synchronous>, transform_indices = @transform_2, window_bounds = array<i64: 32, 4>}, {transform_indices = @transform_3, window_bounds = array<i64: 8, 4>}]} {
    %c0 = arith.constant 0 : index
    %c0_0 = arith.constant 0 : index
    %0 = vector.load %arg1[%c0, %c0_0] : memref<8x96xf32, #tpu.memory_space<vmem>>, vector<8x96xf32>
    %c0_1 = arith.constant 0 : index
    %c0_2 = arith.constant 0 : index
    %1 = vector.load %arg2[%c0_1, %c0_2] : memref<96x32xf32, #tpu.memory_space<vmem>>, vector<96x32xf32>
    %cst = arith.constant dense<0.000000e+00> : vector<8x32xf32>
    %2 = tpu.matmul %0, %1, %cst {dimension_numbers = #tpu.dot_dimension_numbers<[1], [0], [0], [1], [0, 0, 1, 1], [], []>} : vector<8x96xf32>, vector<96x32xf32>, vector<8x32xf32> -> vector<8x32xf32>
    %cst_3 = arith.constant 0.000000e+00 : f32
    %3 = vector.broadcast %cst_3 : f32 to vector<8x32xf32>
    %4 = arith.cmpf oge, %2, %3 : vector<8x32xf32>
    %cst_4 = arith.constant 3.000000e-01 : f32
    %5 = vector.broadcast %cst_4 : f32 to vector<8x32xf32>
    %6 = arith.mulf %5, %2 : vector<8x32xf32>
    %7 = arith.select %4, %2, %6 : vector<8x32xi1>, vector<8x32xf32>
    %c0_5 = arith.constant 0 : index
    %c0_6 = arith.constant 0 : index
    %8 = vector.load %arg3[%c0_5, %c0_6] : memref<32x4xf32, #tpu.memory_space<vmem>>, vector<32x4xf32>
    %cst_7 = arith.constant dense<0.000000e+00> : vector<8x4xf32>
    %9 = tpu.matmul %7, %8, %cst_7 {dimension_numbers = #tpu.dot_dimension_numbers<[1], [0], [0], [1], [0, 0, 1, 1], [], []>} : vector<8x32xf32>, vector<32x4xf32>, vector<8x4xf32> -> vector<8x4xf32>
    %c0_8 = arith.constant 0 : index
    %c0_9 = arith.constant 0 : index
    %10 = vector.load %arg4[%c0_8, %c0_9] : memref<8x4xf32, #tpu.memory_space<vmem>>, vector<8x4xf32>
    tpu.vector_store %arg4[%c0_8, %c0_9], %9 {strides = array<i32>} : memref<8x4xf32, #tpu.memory_space<vmem>>, vector<8x4xf32>,
    return
  }
  func.func @transform_0(%arg0: i32) -> (i32, i32) {
    %c0_i32 = arith.constant 0 : i32
    %c0_i32_0 = arith.constant 0 : i32
    return %arg0, %c0_i32 : i32, i32
  }
  func.func @transform_1(%arg0: i32) -> (i32, i32) {
    %c0_i32 = arith.constant 0 : i32
    %c0_i32_0 = arith.constant 0 : i32
    %c0_i32_1 = arith.constant 0 : i32
    return %c0_i32, %c0_i32_0 : i32, i32
  }
  func.func @transform_2(%arg0: i32) -> (i32, i32) {
    %c0_i32 = arith.constant 0 : i32
    %c0_i32_0 = arith.constant 0 : i32
    %c0_i32_1 = arith.constant 0 : i32
    return %c0_i32, %c0_i32_0 : i32, i32
  }
  func.func @transform_3(%arg0: i32) -> (i32, i32) {
    %c0_i32 = arith.constant 0 : i32
    %c0_i32_0 = arith.constant 0 : i32
    return %arg0, %c0_i32 : i32, i32
  }
}

</mosaic_0001>

<bundles_post_ra>
// kernel: tpu_custom_call.1
= control target key start
LH: loop header
LB: loop body
LE: loop exit
PB: predicated region body
PF: predicated region fallthrough
CT: control target
= control target key end

     0   :  { %v273_v0 = vmov 0.0|0.0   ;;  %vm274_vm0 = vmmov 0   ;;  %v275_v4 = vmov 0.0   ;;  %vm27_vm1 = vcmask 785408   ;;  %s350_s1 = inlined_call_operand.vmem [shape: f32[96,32], index: 1, kind: input, shape index: {}]   ;;  %s351_s2 = inlined_call_operand.vmem [shape: f32[32,4], index: 2, kind: input, shape index: {}]   ;;  %s352_s0 = inlined_call_operand.vmem [shape: f32[8,96], index: 0, kind: input, shape index: {}]   ;;  %s353_s3 = inlined_call_operand.vmem [shape: f32[8,4], index: 3, kind: output, shape index: {}]  }
   0x1   :  { %246 = vmatprep.subr.bf16.mxu0 %v273_v0  ;;  %v15_v1 = vld [vmem:[%s350_s1] sm:$0xff]  ;;  %v16_v2 = vld [vmem:[%s350_s1 + $0x8] sm:$0xff]  ;;  %v17_v3 = vld [vmem:[%s350_s1 + $0x10] sm:$0xff]  ;;  %232 = vmatprep.mubr.msk.f32.mxu0 %vm274_vm0, %v275_v4  ;;  %vm108_vm3 = vcmask 261120   ;;  %vm182_vm4 = vcmask 31744  }
   0x2   :  { %v247_v5 = vpack.c.bf16 %v16_v2, %v15_v1  ;;  %v18_v6 = vld [vmem:[%s350_s1 + $0x18] sm:$0xff]  ;;  %264 = vmatprep.subr.bf16.mxu1 %v273_v0  ;;  %243 = vmatprep.mubr.msk.f32.mxu1 %vm274_vm0, %v275_v4  ;;  %v19_v8 = vld [vmem:[%s350_s1 + $0x20] sm:$0xff]  ;;  %v20_v9 = vld [vmem:[%s350_s1 + $0x28] sm:$0xff] }
   0x3   :  { %v250_v7 = vpack.c.bf16 %v18_v6, %v17_v3  ;;  %v104_v10 = vld [vmem:[%s351_s2] sm:$0xff]  ;;  %v105_v11 = vld [vmem:[%s351_s2 + $0x8] sm:$0xff]  ;;  %v253_v13 = vpack.c.bf16 %v20_v9, %v19_v8  ;;  %v21_v14 = vld [vmem:[%s350_s1 + $0x30] sm:$0xff] }
   0x4   :  { %248 = vmatpush3.bf16.msra.mxu0 %v247_v5  ;;  %v265_v12 = vpack.c.bf16 %v105_v11, %v104_v10  ;;  %v22_v15 = vld [vmem:[%s350_s1 + $0x38] sm:$0xff]  ;;  %v23_v17 = vld [vmem:[%s350_s1 + $0x40] sm:$0xff]  ;;  %v24_v18 = vld [vmem:[%s350_s1 + $0x48] sm:$0xff] }
   0x5   :  { %249 = vmatprep.subr.bf16.mxu0 %v273_v0  ;;  %v256_v16 = vpack.c.bf16 %v22_v15, %v21_v14  ;;  %v259_v19 = vpack.c.bf16 %v24_v18, %v23_v17  ;;  %v25_v20 = vld [vmem:[%s350_s1 + $0x50] sm:$0xff]  ;;  %v26_v21 = vld [vmem:[%s350_s1 + $0x58] sm:$0xff]  ;;  %v14_v23 = vld [vmem:[%s352_s0] sm:$0xff] }
   0x6   :  { %266 = vmatpush3.bf16.msra.mxu1 %v265_v12  ;;  %v262_v22 = vpack.c.bf16 %v26_v21, %v25_v20  ;;  %v106_v24 = vld [vmem:[%s351_s2 + $0x10] sm:$0xff]  ;;  %v107_v25 = vld [vmem:[%s351_s2 + $0x18] sm:$0xff] }
   0x7   :  { %267 = vmatprep.subr.bf16.mxu1 %v273_v0  ;;  %v268_v26 = vpack.c.bf16 %v107_v25, %v106_v24 }
   0x8   :  { %251 = vmatpush3.bf16.msra.mxu0 %v250_v7 }
   0x9   :  { %252 = vmatprep.subr.bf16.mxu0 %v273_v0 }
   0xa   :  { %269 = vmatpush3.bf16.msra.mxu1 %v268_v26 }
   0xc   :  { %254 = vmatpush3.bf16.msra.mxu0 %v253_v13 }
   0xd   :  { %255 = vmatprep.subr.bf16.mxu0 %v273_v0 }
  0x10   :  { %257 = vmatpush3.bf16.msra.mxu0 %v256_v16 }
  0x11   :  { %258 = vmatprep.subr.bf16.mxu0 %v273_v0 }
  0x14   :  { %260 = vmatpush3.bf16.msra.mxu0 %v259_v19 }
  0x15   :  { %261 = vmatprep.subr.bf16.mxu0 %v273_v0 }
  0x18   :  { %263 = vmatpush3.bf16.msra.mxu0 %v262_v22 }
  0x1b   :  { %233 = vmatmul.mubr.msk.f32.vlgmr.msra.gmra.mrb[0].mxu0 %vm27_vm1, %v14_v23 }
  0xee   :  { %v97_v27 = vpop.f32.mrb[0].mxu0 }
  0xef   :  { %vm101_vm2 = vcmp.ge.f32.partialorder %v97_v27, 0.0  ;;  %v102_v28 = vmul.f32 0.3, %v97_v27  ;;  %v234_v29 = vpop.f32.mrb[1].mxu0 }
  0xf1   :  { %v103_v30 = vsel %vm101_vm2, %v97_v27, %v102_v28 }
  0xf2   :  { %244 = vmatmul.mubr.msk.f32.vlgmr.msra.gmra.mrb[0].mxu1 %vm108_vm3, %v103_v30 }
 0x1c5   :  { %v178_v31 = vpop.f32.mrb[0].mxu1 }
 0x1c6   :  { %183 = vst.msk [vmem:[%s353_s3] sm:$0xff] %vm182_vm4, %v178_v31  ;;  %v245_v32 = vpop.f32.mrb[1].mxu1 }

</bundles_post_ra>
